<compile_context>
chip_gen: v6e
topology: v6e:2x2x1
jax: 0.10.0
libtpu: 0.0.40
codegen_flags: <defaults>
</compile_context>

<pallas_src>
import functools

import jax
import jax.numpy as jnp
from jax.experimental import pallas as pl
from jax.experimental.pallas import tpu as pltpu


def _round_up(x: int, m: int) -> int:
    return ((x + m - 1) // m) * m


def _adj_mlp_kernel(x_ref, w0_ref, b0_ref, w1_ref, b1_ref, out_ref, acc_ref,
                    *, num_vars: int, hidden: int, out_dim: int):
    """Fused 2-layer per-variable MLP.

    x_ref  : (tB, tK)      bf16   K-tile of the flattened input
    w0_ref : (tK, D*H)     bf16   K-tile of the (masked) first-layer weights
    b0_ref : (1, D*H)      f32
    w1_ref : (D, H, O)     bf16   per-variable second-layer weights
    b1_ref : (D, O)        f32
    out_ref: (tB, D*O)     f32    packed per-variable outputs (lane-dense)
    acc_ref: (tB, D*H)     f32    VMEM hidden accumulator (never hits HBM)
    """
    k = pl.program_id(1)

    @pl.when(k == 0)
    def _init():
        acc_ref[...] = jnp.zeros_like(acc_ref)

    # Layer 0: stream K-tiles of the dense (mask-folded) weight through the MXU.
    acc_ref[...] += jnp.dot(x_ref[...], w0_ref[...],
                            preferred_element_type=jnp.float32)

    @pl.when(k == pl.num_programs(1) - 1)
    def _finalize():
        # Bias + ReLU only once, on the f32 accumulator.
        hid = jnp.maximum(acc_ref[...] + b0_ref[...], 0.0)      # (tB, D*H) f32
        hid = hid.astype(w1_ref.dtype)                           # bf16 for MXU
        # Layer 1: small per-variable dense; D is a static, moderate count.
        for j in range(num_vars):
            hj = hid[:, j * hidden:(j + 1) * hidden]             # (tB, H)
            oj = jnp.dot(hj, w1_ref[j],
                         preferred_element_type=jnp.float32)     # (tB, O) f32
            oj = oj + b1_ref[j:j + 1, :]                         # (1, O) broadcast
            out_ref[:, j * out_dim:(j + 1) * out_dim] = oj.astype(out_ref.dtype)


def simple_adjacency_mlp(x, w0, b0, w1, b1, *, block_b: int = 256,
                         block_k: int = 512):
    """Forward pass of SimpleAdjacencyMLP(input_dim=D, layers=[F, H, O], ReLU).

    x : (B, D, F) float32   per-variable input features
    w0: (D, H, D*F)         first OffDiagLinear weight, torch (out, in) layout
    b0: (D, H)
    w1: (D, O, H)           second OffDiagLinear weight
    b1: (D, O)
    returns (B, D, O) float32
    """
    B, D, F = x.shape
    H = w0.shape[1]
    O = w1.shape[1]
    K = D * F
    assert w0.shape == (D, H, K) and b0.shape == (D, H)
    assert w1.shape == (D, O, H) and b1.shape == (D, O)

    # ---- fold the static off-diagonal mask into W0 (done once, in JAX) ----
    feat_var = jnp.arange(K) // F                                   # (K,)
    keep = (feat_var[None, :] != jnp.arange(D)[:, None])            # (D, K)
    w0m = w0 * keep[:, None, :].astype(w0.dtype)

    # ---- MXU-friendly 2-D layouts, bf16 weights/activations, f32 biases ----
    # w0r[k, j*H + m] = w0m[j, m, k]  ->  x_flat @ w0r == per-variable hidden
    w0r = jnp.transpose(w0m, (2, 0, 1)).reshape(K, D * H).astype(jnp.bfloat16)
    w1r = jnp.transpose(w1, (0, 2, 1)).astype(jnp.bfloat16)         # (D, H, O)
    b0r = b0.reshape(1, D * H).astype(jnp.float32)
    b1r = b1.astype(jnp.float32)
    xf = x.reshape(B, K).astype(jnp.bfloat16)

    # ---- tiling / zero padding (keeps the math exact) ----
    tB = min(block_b, _round_up(B, 8))
    Bp = _round_up(B, tB)
    tK = min(block_k, _round_up(K, 128))
    Kp = _round_up(K, tK)
    xf = jnp.pad(xf, ((0, Bp - B), (0, Kp - K)))
    w0r = jnp.pad(w0r, ((0, Kp - K), (0, 0)))

    grid = (Bp // tB, Kp // tK)          # (batch tiles, K tiles) -- K last.
    kernel = functools.partial(_adj_mlp_kernel,
                               num_vars=D, hidden=H, out_dim=O)

    out = pl.pallas_call(
        kernel,
        out_shape=jax.ShapeDtypeStruct((Bp, D * O), jnp.float32),
        grid_spec=pltpu.PrefetchScalarGridSpec(
            num_scalar_prefetch=0,
            grid=grid,
            in_specs=[
                pl.BlockSpec((tB, tK), lambda b, k: (b, k)),        # x tile
                pl.BlockSpec((tK, D * H), lambda b, k: (k, 0)),     # W0 tile
                pl.BlockSpec((1, D * H), lambda b, k: (0, 0)),      # b0
                pl.BlockSpec((D, H, O), lambda b, k: (0, 0, 0)),    # W1
                pl.BlockSpec((D, O), lambda b, k: (0, 0)),          # b1
            ],
            out_specs=pl.BlockSpec((tB, D * O), lambda b, k: (b, 0)),
            scratch_shapes=[pltpu.VMEM((tB, D * H), jnp.float32)],
        ),
        compiler_params=pltpu.CompilerParams(
            dimension_semantics=("parallel", "arbitrary"),
        ),
    )(xf, w0r, b0r, w1r, b1r)

    # Row-major contiguous reshape: metadata-only, no transpose / HBM round-trip.
    return out[:B].reshape(B, D, O)


def _reference(x, w0, b0, w1, b1):
    """Pure-JAX reference with the same bf16 rounding points as the kernel."""
    B, D, F = x.shape
    K = D * F
    feat_var = jnp.arange(K) // F
    keep = (feat_var[None, :] != jnp.arange(D)[:, None]).astype(w0.dtype)
    w0m = w0 * keep[:, None, :]
    xb = x.reshape(B, K).astype(jnp.bfloat16).astype(jnp.float32)
    w0b = w0m.astype(jnp.bfloat16).astype(jnp.float32)
    w1b = w1.astype(jnp.bfloat16).astype(jnp.float32)
    h = jnp.einsum("bk,dhk->bdh", xb, w0b) + b0[None]
    h = jnp.maximum(h, 0.0)
    h = h.astype(jnp.bfloat16).astype(jnp.float32)
    return jnp.einsum("bdh,doh->bdo", h, w1b) + b1[None]


if __name__ == "__main__":
    # SimpleAdjacencyMLP(input_dim=D, layers=[F, H, O], activation=nn.ReLU())
    B, D, F, H, O = 2, 4, 16, 32, 8

    key = jax.random.PRNGKey(0)
    k1, k2, k3, k4, k5 = jax.random.split(key, 5)
    x = jax.random.normal(k1, (B, D, F), jnp.float32)
    w0 = 0.1 * jax.random.normal(k2, (D, H, D * F), jnp.float32)
    b0 = 0.1 * jax.random.normal(k3, (D, H), jnp.float32)
    w1 = 0.1 * jax.random.normal(k4, (D, O, H), jnp.float32)
    b1 = 0.1 * jax.random.normal(k5, (D, O), jnp.float32)

    out = jax.block_until_ready(simple_adjacency_mlp(x, w0, b0, w1, b1))
    ref = jax.block_until_ready(_reference(x, w0, b0, w1, b1))

    assert out.shape == (B, D, O), out.shape
    max_err = float(jnp.max(jnp.abs(out - ref)))
    assert max_err < 5e-2, f"max abs err {max_err}"
    print("KERNEL_OK")
</pallas_src>

<mosaic_0001>
module attributes {stable_mosaic.version = 11 : i64} {
  func.func @_adj_mlp_kernel(%arg0: i32, %arg1: i32, %arg2: memref<8x128xbf16, #tpu.memory_space<vmem>>, %arg3: memref<128x128xbf16, #tpu.memory_space<vmem>>, %arg4: memref<1x128xf32, #tpu.memory_space<vmem>>, %arg5: memref<4x32x8xbf16, #tpu.memory_space<vmem>>, %arg6: memref<4x8xf32, #tpu.memory_space<vmem>>, %arg7: memref<8x32xf32, #tpu.memory_space<vmem>>, %arg8: memref<8x128xf32, #tpu.memory_space<vmem>>) attributes {dimension_semantics = [#tpu.dimension_semantics<parallel>, #tpu.dimension_semantics<arbitrary>], iteration_bounds = array<i64: 1, 1>, scalar_prefetch = 0 : i64, scratch_operands = 1 : i64, tpu.core_type = #tpu.core_type<tc>, window_params = [{transform_indices = @transform_0, window_bounds = array<i64: 8, 128>}, {transform_indices = @transform_1, window_bounds = array<i64: 128, 128>}, {pipeline_mode = #tpu.pipeline_mode<synchronous>, transform_indices = @transform_2, window_bounds = array<i64: 1, 128>}, {pipeline_mode = #tpu.pipeline_mode<synchronous>, transform_indices = @transform_3, window_bounds = array<i64: 4, 32, 8>}, {pipeline_mode = #tpu.pipeline_mode<synchronous>, transform_indices = @transform_4, window_bounds = array<i64: 4, 8>}, {transform_indices = @transform_5, window_bounds = array<i64: 8, 32>}]} {
    %c0_i32 = arith.constant 0 : i32
    %0 = arith.cmpi eq, %arg1, %c0_i32 : i32
    %1 = arith.extui %0 : i1 to i32
    %c0_i32_0 = arith.constant 0 : i32
    %2 = arith.cmpi ne, %1, %c0_i32_0 : i32
    scf.if %2 {
      %cst_10 = arith.constant 0.000000e+00 : f32
      %12 = vector.broadcast %cst_10 : f32 to vector<8x128xf32>
      %c0_11 = arith.constant 0 : index
      %c0_12 = arith.constant 0 : index
      %13 = vector.load %arg8[%c0_11, %c0_12] : memref<8x128xf32, #tpu.memory_space<vmem>>, vector<8x128xf32>
      tpu.vector_store %arg8[%c0_11, %c0_12], %12 {strides = array<i32>} : memref<8x128xf32, #tpu.memory_space<vmem>>, vector<8x128xf32>,
    } else {
    }
    %c0 = arith.constant 0 : index
    %c0_1 = arith.constant 0 : index
    %3 = vector.load %arg8[%c0, %c0_1] : memref<8x128xf32, #tpu.memory_space<vmem>>, vector<8x128xf32>
    %c0_2 = arith.constant 0 : index
    %c0_3 = arith.constant 0 : index
    %4 = vector.load %arg2[%c0_2, %c0_3] : memref<8x128xbf16, #tpu.memory_space<vmem>>, vector<8x128xbf16>
    %c0_4 = arith.constant 0 : index
    %c0_5 = arith.constant 0 : index
    %5 = vector.load %arg3[%c0_4, %c0_5] : memref<128x128xbf16, #tpu.memory_space<vmem>>, vector<128x128xbf16>
    %cst = arith.constant dense<0.000000e+00> : vector<8x128xf32>
    %6 = tpu.matmul %4, %5, %cst {dimension_numbers = #tpu.dot_dimension_numbers<[1], [0], [0], [1], [0, 0, 1, 1], [], []>} : vector<8x128xbf16>, vector<128x128xbf16>, vector<8x128xf32> -> vector<8x128xf32>
    %7 = arith.addf %3, %6 : vector<8x128xf32>
    %c0_6 = arith.constant 0 : index
    %c0_7 = arith.constant 0 : index
    %8 = vector.load %arg8[%c0_6, %c0_7] : memref<8x128xf32, #tpu.memory_space<vmem>>, vector<8x128xf32>
    tpu.vector_store %arg8[%c0_6, %c0_7], %7 {strides = array<i32>} : memref<8x128xf32, #tpu.memory_space<vmem>>, vector<8x128xf32>,
    %c0_i32_8 = arith.constant 0 : i32
    %9 = arith.cmpi eq, %arg1, %c0_i32_8 : i32
    %10 = arith.extui %9 : i1 to i32
    %c0_i32_9 = arith.constant 0 : i32
    %11 = arith.cmpi ne, %10, %c0_i32_9 : i32
    scf.if %11 {
      %c0_10 = arith.constant 0 : index
      %c0_11 = arith.constant 0 : index
      %12 = vector.load %arg8[%c0_10, %c0_11] : memref<8x128xf32, #tpu.memory_space<vmem>>, vector<8x128xf32>
      %c0_12 = arith.constant 0 : index
      %c0_13 = arith.constant 0 : index
      %13 = vector.load %arg4[%c0_12, %c0_13] : memref<1x128xf32, #tpu.memory_space<vmem>>, vector<1x128xf32>
      %14 = vector.broadcast %13 : vector<1x128xf32> to vector<8x128xf32>
      %15 = arith.addf %12, %14 : vector<8x128xf32>
      %cst_14 = arith.constant 0.000000e+00 : f32
      %16 = vector.broadcast %cst_14 : f32 to vector<8x128xf32>
      %17 = arith.maximumf %15, %16 : vector<8x128xf32>
      %18 = arith.truncf %17 : vector<8x128xf32> to vector<8x128xbf16>
      %19 = vector.extract_strided_slice %18 {offsets = [0, 0], sizes = [8, 32], strides = [1, 1]} : vector<8x128xbf16> to vector<8x32xbf16>
      %c0_15 = arith.constant 0 : index
      %c0_16 = arith.constant 0 : index
      %c0_17 = arith.constant 0 : index
      %20 = vector.load %arg5[%c0_15, %c0_16, %c0_17] : memref<4x32x8xbf16, #tpu.memory_space<vmem>>, vector<1x32x8xbf16>
      %21 = vector.shape_cast %20 : vector<1x32x8xbf16> to vector<32x8xbf16>
      %cst_18 = arith.constant dense<0.000000e+00> : vector<8x8xf32>
      %22 = tpu.matmul %19, %21, %cst_18 {dimension_numbers = #tpu.dot_dimension_numbers<[1], [0], [0], [1], [0, 0, 1, 1], [], []>} : vector<8x32xbf16>, vector<32x8xbf16>, vector<8x8xf32> -> vector<8x8xf32>
      %c0_19 = arith.constant 0 : index
      %c0_20 = arith.constant 0 : index
      %23 = vector.load %arg6[%c0_19, %c0_20] : memref<4x8xf32, #tpu.memory_space<vmem>>, vector<1x8xf32>
      %24 = vector.broadcast %23 : vector<1x8xf32> to vector<8x8xf32>
      %25 = arith.addf %22, %24 : vector<8x8xf32>
      %c0_21 = arith.constant 0 : index
      %c0_22 = arith.constant 0 : index
      %26 = vector.load %arg7[%c0_21, %c0_22] : memref<8x32xf32, #tpu.memory_space<vmem>>, vector<8x8xf32>
      tpu.vector_store %arg7[%c0_21, %c0_22], %25 {strides = array<i32>} : memref<8x32xf32, #tpu.memory_space<vmem>>, vector<8x8xf32>,
      %27 = vector.extract_strided_slice %18 {offsets = [0, 32], sizes = [8, 32], strides = [1, 1]} : vector<8x128xbf16> to vector<8x32xbf16>
      %c1 = arith.constant 1 : index
      %c0_23 = arith.constant 0 : index
      %c0_24 = arith.constant 0 : index
      %28 = vector.load %arg5[%c1, %c0_23, %c0_24] : memref<4x32x8xbf16, #tpu.memory_space<vmem>>, vector<1x32x8xbf16>
      %29 = vector.shape_cast %28 : vector<1x32x8xbf16> to vector<32x8xbf16>
      %cst_25 = arith.constant dense<0.000000e+00> : vector<8x8xf32>
      %30 = tpu.matmul %27, %29, %cst_25 {dimension_numbers = #tpu.dot_dimension_numbers<[1], [0], [0], [1], [0, 0, 1, 1], [], []>} : vector<8x32xbf16>, vector<32x8xbf16>, vector<8x8xf32> -> vector<8x8xf32>
      %c1_26 = arith.constant 1 : index
      %c0_27 = arith.constant 0 : index
      %31 = vector.load %arg6[%c1_26, %c0_27] : memref<4x8xf32, #tpu.memory_space<vmem>>, vector<1x8xf32>
      %32 = vector.broadcast %31 : vector<1x8xf32> to vector<8x8xf32>
      %33 = arith.addf %30, %32 : vector<8x8xf32>
      %c0_28 = arith.constant 0 : index
      %c8 = arith.constant 8 : index
      %34 = vector.load %arg7[%c0_28, %c8] : memref<8x32xf32, #tpu.memory_space<vmem>>, vector<8x8xf32>
      tpu.vector_store %arg7[%c0_28, %c8], %33 {strides = array<i32>} : memref<8x32xf32, #tpu.memory_space<vmem>>, vector<8x8xf32>,
      %35 = vector.extract_strided_slice %18 {offsets = [0, 64], sizes = [8, 32], strides = [1, 1]} : vector<8x128xbf16> to vector<8x32xbf16>
      %c2 = arith.constant 2 : index
      %c0_29 = arith.constant 0 : index
      %c0_30 = arith.constant 0 : index
      %36 = vector.load %arg5[%c2, %c0_29, %c0_30] : memref<4x32x8xbf16, #tpu.memory_space<vmem>>, vector<1x32x8xbf16>
      %37 = vector.shape_cast %36 : vector<1x32x8xbf16> to vector<32x8xbf16>
      %cst_31 = arith.constant dense<0.000000e+00> : vector<8x8xf32>
      %38 = tpu.matmul %35, %37, %cst_31 {dimension_numbers = #tpu.dot_dimension_numbers<[1], [0], [0], [1], [0, 0, 1, 1], [], []>} : vector<8x32xbf16>, vector<32x8xbf16>, vector<8x8xf32> -> vector<8x8xf32>
      %c2_32 = arith.constant 2 : index
      %c0_33 = arith.constant 0 : index
      %39 = vector.load %arg6[%c2_32, %c0_33] : memref<4x8xf32, #tpu.memory_space<vmem>>, vector<1x8xf32>
      %40 = vector.broadcast %39 : vector<1x8xf32> to vector<8x8xf32>
      %41 = arith.addf %38, %40 : vector<8x8xf32>
      %c0_34 = arith.constant 0 : index
      %c16 = arith.constant 16 : index
      %42 = vector.load %arg7[%c0_34, %c16] : memref<8x32xf32, #tpu.memory_space<vmem>>, vector<8x8xf32>
      tpu.vector_store %arg7[%c0_34, %c16], %41 {strides = array<i32>} : memref<8x32xf32, #tpu.memory_space<vmem>>, vector<8x8xf32>,
      %43 = vector.extract_strided_slice %18 {offsets = [0, 96], sizes = [8, 32], strides = [1, 1]} : vector<8x128xbf16> to vector<8x32xbf16>
      %c3 = arith.constant 3 : index
      %c0_35 = arith.constant 0 : index
      %c0_36 = arith.constant 0 : index
      %44 = vector.load %arg5[%c3, %c0_35, %c0_36] : memref<4x32x8xbf16, #tpu.memory_space<vmem>>, vector<1x32x8xbf16>
      %45 = vector.shape_cast %44 : vector<1x32x8xbf16> to vector<32x8xbf16>
      %cst_37 = arith.constant dense<0.000000e+00> : vector<8x8xf32>
      %46 = tpu.matmul %43, %45, %cst_37 {dimension_numbers = #tpu.dot_dimension_numbers<[1], [0], [0], [1], [0, 0, 1, 1], [], []>} : vector<8x32xbf16>, vector<32x8xbf16>, vector<8x8xf32> -> vector<8x8xf32>
      %c3_38 = arith.constant 3 : index
      %c0_39 = arith.constant 0 : index
      %47 = vector.load %arg6[%c3_38, %c0_39] : memref<4x8xf32, #tpu.memory_space<vmem>>, vector<1x8xf32>
      %48 = vector.broadcast %47 : vector<1x8xf32> to vector<8x8xf32>
      %49 = arith.addf %46, %48 : vector<8x8xf32>
      %c0_40 = arith.constant 0 : index
      %c24 = arith.constant 24 : index
      %50 = vector.load %arg7[%c0_40, %c24] : memref<8x32xf32, #tpu.memory_space<vmem>>, vector<8x8xf32>
      tpu.vector_store %arg7[%c0_40, %c24], %49 {strides = array<i32>} : memref<8x32xf32, #tpu.memory_space<vmem>>, vector<8x8xf32>,
    } else {
    }
    return
  }
  func.func @transform_0(%arg0: i32, %arg1: i32) -> (i32, i32) {
    %c0_i32 = arith.constant 0 : i32
    return %arg0, %arg1 : i32, i32
  }
  func.func @transform_1(%arg0: i32, %arg1: i32) -> (i32, i32) {
    %c0_i32 = arith.constant 0 : i32
    %c0_i32_0 = arith.constant 0 : i32
    return %arg1, %c0_i32 : i32, i32
  }
  func.func @transform_2(%arg0: i32, %arg1: i32) -> (i32, i32) {
    %c0_i32 = arith.constant 0 : i32
    %c0_i32_0 = arith.constant 0 : i32
    %c0_i32_1 = arith.constant 0 : i32
    return %c0_i32, %c0_i32_0 : i32, i32
  }
  func.func @transform_3(%arg0: i32, %arg1: i32) -> (i32, i32, i32) {
    %c0_i32 = arith.constant 0 : i32
    %c0_i32_0 = arith.constant 0 : i32
    %c0_i32_1 = arith.constant 0 : i32
    %c0_i32_2 = arith.constant 0 : i32
    return %c0_i32, %c0_i32_0, %c0_i32_1 : i32, i32, i32
  }
  func.func @transform_4(%arg0: i32, %arg1: i32) -> (i32, i32) {
    %c0_i32 = arith.constant 0 : i32
    %c0_i32_0 = arith.constant 0 : i32
    %c0_i32_1 = arith.constant 0 : i32
    return %c0_i32, %c0_i32_0 : i32, i32
  }
  func.func @transform_5(%arg0: i32, %arg1: i32) -> (i32, i32) {
    %c0_i32 = arith.constant 0 : i32
    %c0_i32_0 = arith.constant 0 : i32
    return %arg0, %c0_i32 : i32, i32
  }
}

</mosaic_0001>

<bundles_post_ra>
// kernel: tpu_custom_call.1
= control target key start
LH: loop header
LB: loop body
LE: loop exit
PB: predicated region body
PF: predicated region fallthrough
CT: control target
= control target key end

     0   :  { %v607_v1 = vmov 0.0   ;;  %vm608_vm0 = vmmov 0   ;;  %s745_s0 = inlined_call_operand.vmem [shape: bf16[8,128], index: 0, kind: input, shape index: {}]   ;;  %s746_s1 = inlined_call_operand.vmem [shape: bf16[128,128], index: 1, kind: input, shape index: {}]   ;;  %s747_s2 = inlined_call_operand.vmem [shape: f32[1,128], index: 2, kind: input, shape index: {}]   ;;  %s748_s3 = inlined_call_operand.vmem [shape: bf16[4,32,8], index: 3, kind: input, shape index: {}]   ;;  %s749_s4 = inlined_call_operand.vmem [shape: f32[4,8], index: 4, kind: input, shape index: {}]   ;;  %s750_s5 = inlined_call_operand.hbm [shape: f32[8,32], index: 5, kind: output, shape index: {}]  }
   0x1   :  { %v569_v0 = vld [vmem:[%s746_s1 + $0x38] sm:$0xff]   ;;  %508 = vmatprep.subr.bf16.mxu0 %v607_v1  ;;  %528 = vmatprep.subr.bf16.mxu1 %v607_v1  ;;  %v570_v2 = vld [vmem:[%s746_s1 + $0x30] sm:$0xff]   ;;  %v571_v3 = vld [vmem:[%s746_s1 + $0x28] sm:$0xff]  }
   0x2   :  { %509 = vmatpush3.bf16.msra.mxu0 %v569_v0  ;;  %524 = vmatprep.mubr.msk.bf16.mxu0 %vm608_vm0, %v607_v1  ;;  %v572_v4 = vld [vmem:[%s746_s1 + $0x20] sm:$0xff]  }
   0x3   :  { %510 = vmatprep.subr.bf16.mxu0 %v607_v1  ;;  %532 = vmatprep.mubr.msk.bf16.mxu1 %vm608_vm0, %v607_v1 }
   0x6   :  { %511 = vmatpush3.bf16.msra.mxu0 %v570_v2 }
   0x7   :  { %512 = vmatprep.subr.bf16.mxu0 %v607_v1 }
   0xa   :  { %513 = vmatpush3.bf16.msra.mxu0 %v571_v3 }
   0xb   :  { %514 = vmatprep.subr.bf16.mxu0 %v607_v1 }
   0xc   :  { %10 = vsyncpa [#allocation4], 0  ;;  %v573_v5 = vld [vmem:[%s746_s1 + $0x18] sm:$0xff]   ;;  %v574_v6 = vld [vmem:[%s746_s1 + $0x10] sm:$0xff]   ;;  %vm170_vm1 = vcmask 261120   ;;  %s609_s17 = smov 32  }
   0xd   :  { %v575_v7 = vld [vmem:[%s746_s1 + $0x8] sm:$0xff]   ;;  %v576_v8 = vld [vmem:[%s746_s1] sm:$0xff]   ;;  %v579_v19 = vld [vmem:[%s748_s3 + $0x18] sm:$0xff]   ;;  %s610_s18 = smov 96   ;;  %s611_s20 = smov 64   ;;  %vm214_vm2 = vcmask 64512  }
   0xe   :  { %515 = vmatpush3.bf16.msra.mxu0 %v572_v4  ;;  %v28_v9 = vld [vmem:[%s745_s0] sm:$0xf]  ;;  %v577_v10 = vld [vmem:[%s748_s3 + $0x8] sm:$0xff]   ;;  %v580_v21 = vld [vmem:[%s748_s3 + $0x10] sm:$0xff]   ;;  %s612_s7 = smov 8   ;;  %s613_s10 = smov 16  }
   0xf   :  { %516 = vmatprep.subr.bf16.mxu0 %v607_v1  ;;  %529 = vmatpush3.bf16.msra.mxu1 %v577_v10  ;;  %v578_v11 = vld [vmem:[%s748_s3] sm:$0xff]   ;;  %v581_v22 = vld [vmem:[%s748_s3 + $0x28] sm:$0xff]   ;;  %v583_v25 = vld [vmem:[%s748_s3 + $0x38] sm:$0xff]   ;;  %s614_s13 = smov 24   ;;  %vm288_vm3 = vcmask 130112   ;;  %vm361_vm4 = vcmask 195712  }
  0x10   :  { %530 = vmatprep.subr.bf16.mxu1 %v607_v1  ;;  %v458_v12 = vld [vmem:[%s747_s2] ss:$0 sm:$0xff]  ;;  %v584_v27 = vld [vmem:[%s748_s3 + $0x30] sm:$0xff]   ;;  %v467_v35 = vld [vmem:[%s749_s4 + $0x1] ss:$0 sm:$0xff]  ;;  %s615_s14 = smov [#allocation3]  }
  0x11   :  { %v582_v24 = vld [vmem:[%s748_s3 + $0x20] sm:$0xff]   ;;  %s442_s1 = sshll.u32 %s615_s14, 4  ;;  %vm434_vm5 = vcmask 261312   ;;  %s443_s1 = int_to_ptr.vmem [resolvable:$true] %s442_s1 }
  0x12   :  { %517 = vmatpush3.bf16.msra.mxu0 %v573_v5  ;;  %v459_v29 = vld [vmem:[%s749_s4] ss:$0 sm:$0xff]  ;;  %v475_v41 = vld [vmem:[%s749_s4 + $0x2] ss:$0 sm:$0xff]  ;;  %v483_v47 = vld [vmem:[%s749_s4 + $0x3] ss:$0 sm:$0xff]  ;;  %p590_p1 = scmp.lt.s32.totalorder %s443_s1, %s443_s1 }
  0x13   :  { %518 = vmatprep.subr.bf16.mxu0 %v607_v1  ;;  %531 = vmatpush3.bf16.msra.mxu1 %v578_v11  ;;  %s585_s4 = scalar_lea.vmem %s443_s1, 128 }
  0x14   :  { %536 = vmatprep.subr.bf16.mxu1 %v607_v1  ;;  %p586_p0 = scmp.ne.s32.totalorder %s443_s1, %s585_s4  ;;  %p591_p2 = scmp.lt.s32.totalorder %s585_s4, %s585_s4 }
  0x16   :  { %519 = vmatpush3.bf16.msra.mxu0 %v574_v6  ;;  %p592_p3 = por %p591_p2, %p590_p1 }
  0x17   :  { %520 = vmatprep.subr.bf16.mxu0 %v607_v1 }
  0x18   :  { %p593_p4 = pnand %p592_p3, %p586_p0 }
  0x1a   :  { %521 = vmatpush3.bf16.msra.mxu0 %v575_v7 }
  0x1b   :  { %522 = vmatprep.subr.bf16.mxu0 %v607_v1 }
  0x1e   :  { %523 = vmatpush3.bf16.msra.mxu0 %v576_v8 }
  0x21   :  { %525 = vmatmul.mubr.bf16.vlgmr.msra.gmra.mxu0 %v28_v9 }
  0xe1   :  { %v127_v13 = vpop.f32.mrf.mxu0 }
  0xe2   :  { %v146_v14 = vadd.f32 %v458_v12, %v127_v13 }
  0xe3   :  { %v526_v15 = vpop.f32.mrf.mxu0 }
  0xe4   :  { %v147_v16 = vmax.f32 %v146_v14, 0.0 }
  0xe5   :  { %v130_v17 = vpop.f32.mrf.mxu0 }
  0xe6   :  { %v148_v18 = vpack.c.bf16 %v147_v16, %v147_v16 }
  0xe7   :  { %v527_v20 = vpop.f32.mrf.mxu0 }
  0xe8   :  { %373 = vrot.lane.b32.xlu1 %v148_v18, %s609_s17  ;;  %227 = vrot.lane.b32.xlu0 %v148_v18, %s610_s18 }
  0xe9   :  { %533 = vmatmul.mubr.msk.bf16.vlgmr.msra.gmra.mxu1 %vm170_vm1, %v148_v18 }
  0xea   :  { %537 = vmatpush3.bf16.msra.mxu1 %v579_v19  ;;  %540 = vmatprep.mubr.msk.bf16.mxu1 %vm608_vm0, %v607_v1 }
  0xeb   :  { %538 = vmatprep.subr.bf16.mxu1 %v607_v1 }
  0xec   :  { %300 = vrot.lane.b32.xlu0 %v148_v18, %s611_s20 }
  0xee   :  { %539 = vmatpush3.bf16.msra.mxu1 %v580_v21 }
  0xef   :  { %544 = vmatprep.subr.bf16.mxu1 %v607_v1 }
 0x15a   :  { %v228_v23 = vpop.permute.xlu0 %227  ;;  %v374_v28 = vpop.permute.xlu1 %373 }
 0x15b   :  { %541 = vmatmul.mubr.msk.bf16.vlgmr.msra.gmra.mxu1 %vm170_vm1, %v228_v23 }
 0x15c   :  { %545 = vmatpush3.bf16.msra.mxu1 %v581_v22  ;;  %548 = vmatprep.mubr.msk.bf16.mxu1 %vm608_vm0, %v607_v1 }
 0x15d   :  { %546 = vmatprep.subr.bf16.mxu1 %v607_v1 }
 0x15e   :  { %v301_v26 = vpop.permute.xlu0 %300 }
 0x160   :  { %547 = vmatpush3.bf16.msra.mxu1 %v582_v24 }
 0x161   :  { %552 = vmatprep.subr.bf16.mxu1 %v607_v1 }
 0x163   :  { %549 = vmatmul.mubr.msk.bf16.vlgmr.msra.gmra.mxu1 %vm170_vm1, %v301_v26 }
 0x164   :  { %553 = vmatpush3.bf16.msra.mxu1 %v583_v25  ;;  %556 = vmatprep.mubr.msk.bf16.mxu1 %vm608_vm0, %v607_v1 }
 0x165   :  { %554 = vmatprep.subr.bf16.mxu1 %v607_v1 }
 0x168   :  { %555 = vmatpush3.bf16.msra.mxu1 %v584_v27 }
 0x16b   :  { %557 = vmatmul.mubr.msk.bf16.vlgmr.msra.gmra.mxu1 %vm170_vm1, %v374_v28 }
 0x1a9   :  { %v208_v30 = vpop.f32.mrf.mxu1 }
 0x1aa   :  { %v209_v31 = vadd.f32 %v459_v29, %v208_v30 }
 0x1ab   :  { %v534_v32 = vpop.f32.mrf.mxu1 }
 0x1ac   :  { %215 = vst.msk [vmem:[#allocation3] sm:$0xff] %vm214_vm2, %v209_v31 }
 0x1ad   :  { %v211_v33 = vpop.f32.mrf.mxu1 }
 0x1af   :  { %v535_v34 = vpop.f32.mrf.mxu1 }
 0x21b   :  { %v278_v36 = vpop.f32.mrf.mxu1 }
 0x21c   :  { %v279_v37 = vadd.f32 %v467_v35, %v278_v36 }
 0x21d   :  { %v542_v38 = vpop.f32.mrf.mxu1 }
 0x21e   :  { %285 = vrot.lane.b32.xlu1 %v279_v37, %s612_s7 }
 0x21f   :  { %v281_v39 = vpop.f32.mrf.mxu1 }
 0x221   :  { %v543_v40 = vpop.f32.mrf.mxu1 }
 0x223   :  { %v351_v42 = vpop.f32.mrf.mxu1 }
 0x224   :  { %v352_v43 = vadd.f32 %v475_v41, %v351_v42 }
 0x225   :  { %v550_v44 = vpop.f32.mrf.mxu1 }
 0x226   :  { %358 = vrot.lane.b32.xlu0 %v352_v43, %s613_s10 }
 0x227   :  { %v354_v45 = vpop.f32.mrf.mxu1 }
 0x229   :  { %v551_v46 = vpop.f32.mrf.mxu1 }
 0x22b   :  { %v424_v48 = vpop.f32.mrf.mxu1 }
 0x22c   :  { %v425_v49 = vadd.f32 %v483_v47, %v424_v48 }
 0x22d   :  { %v558_v50 = vpop.f32.mrf.mxu1 }
 0x22e   :  { %431 = vrot.lane.b32.xlu1 %v425_v49, %s614_s13 }
 0x22f   :  { %v427_v51 = vpop.f32.mrf.mxu1 }
 0x231   :  { %v559_v52 = vpop.f32.mrf.mxu1 }
 0x290   :  { %v286_v53 = vpop.permute.xlu1 %285 }
 0x291   :  { %289 = vst.msk [vmem:[#allocation3] sm:$0xff] %vm288_vm3, %v286_v53 }
 0x298   :  { %v359_v54 = vpop.permute.xlu0 %358 }
 0x299   :  { %362 = vst.msk [vmem:[#allocation3] sm:$0xff] %vm361_vm4, %v359_v54 }
 0x2a0   :  { %v432_v55 = vpop.permute.xlu1 %431 }
 0x2a1   :  { %435 = vst.msk [vmem:[#allocation3] sm:$0xff] %vm434_vm5, %v432_v55 }
 0x2a2   :  { %596 = shalt.err (!%p593_p4)
}
 0x2a3   :  { %445 = dma.vmem_to_hbm [thread:$0]  %s443_s1, 128, %s750_s5, [#allocation4]  }
 0x2a4   :  { %605 = dma.done.wait [#allocation4], 128  }
 0x2a5   :  { %606 = vsyncadd [#allocation4], 4294967168 }
 0x2a6   :  { %449 = vsyncpa [#allocation4], 1 }

</bundles_post_ra>
